<compile_context>
chip_gen: v7x
topology: tpu7x:2x2x1
jax: 0.10.0
libtpu: 0.0.40
codegen_flags: <defaults>
</compile_context>

<pallas_src>
import functools

import jax
import jax.numpy as jnp
from jax.experimental import pallas as pl
from jax.experimental.pallas import tpu as pltpu

HIDDEN = 64     # feature width of the MLP
HEAD_N = 128    # head output padded to a full 128-lane vreg (lane-dense store)


def _round_up(n, m):
    return ((n + m - 1) // m) * m


def _dueling_kernel(x_ref, wf_ref, bf_ref, wh_ref, bh_ref, q_ref, *, in_pad):
    """One batch tile: q = x @ W1 -> ReLU -> @ W2 -> ReLU -> @ Wq (folded head)."""
    x = x_ref[...]                                # (TB, in_pad), compute dtype
    w1 = wf_ref[0:in_pad, :]                      # (in_pad, 64)
    w2 = wf_ref[in_pad:in_pad + HIDDEN, :]        # (64, 64)
    b1 = bf_ref[0:1, :]                           # (1, 64) f32
    b2 = bf_ref[1:2, :]                           # (1, 64) f32

    # ---- feature MLP: two MXU matmuls (f32 accumulation) + VPU ReLU ----
    h = jnp.dot(x, w1, preferred_element_type=jnp.float32) + b1
    h = jnp.maximum(h, 0.0)
    h = jnp.dot(h.astype(w2.dtype), w2, preferred_element_type=jnp.float32) + b2
    h = jnp.maximum(h, 0.0)
    # Dropout(p) acts as identity at inference time.

    # ---- folded dueling head: one matmul, dueling combination is pre-folded
    #      into wh/bh on the host, output already lane-dense (128 lanes) ----
    q = jnp.dot(h.astype(wh_ref.dtype), wh_ref[...],
                preferred_element_type=jnp.float32) + bh_ref[0:1, :]
    q_ref[...] = q.astype(q_ref.dtype)


def pack_params(params, in_dim, out_dim, *, compute_dtype=jnp.bfloat16):
    """One-time host-side packing (hoisted out of the per-call hot path).

    Folds the dueling combination into the head weights:
        q_j = h . (wv + wa_j - mean_k wa_k) + (bv + ba_j - mean_k ba_k)
    """
    assert out_dim <= HEAD_N
    w1, b1, w2, b2, wv, bv, wa, ba = params
    in_pad = _round_up(in_dim, 8)

    # Folded head (exact in f32).
    wq = wa + (wv - jnp.mean(wa, axis=1, keepdims=True))      # (64, out_dim)
    bq = ba + (bv - jnp.mean(ba, axis=1, keepdims=True))      # (1, out_dim)

    # Feature weight slab: [W1 (padded rows); W2] -> (in_pad + 64, 64).
    w_feat = jnp.concatenate(
        [jnp.pad(w1, ((0, in_pad - in_dim), (0, 0))), w2], axis=0
    ).astype(compute_dtype)
    # Feature biases, sublane-padded to 8 rows, kept in f32.
    b_feat = jnp.zeros((8, HIDDEN), jnp.float32).at[0:1].set(b1).at[1:2].set(b2)

    # Head padded to 128 output lanes (lane-dense store); extra lanes are zero.
    w_head = jnp.zeros((HIDDEN, HEAD_N), jnp.float32)
    w_head = w_head.at[:, 0:out_dim].set(wq).astype(compute_dtype)
    b_head = jnp.zeros((8, HEAD_N), jnp.float32).at[0:1, 0:out_dim].set(bq)

    return {
        "w_feat": w_feat, "b_feat": b_feat,
        "w_head": w_head, "b_head": b_head,
        "in_dim": in_dim, "in_pad": in_pad, "out_dim": out_dim,
        "compute_dtype": compute_dtype,
    }


def dueling_network_forward(x, packed, *, tile_b=2048):
    """x: (B, in_dim) float32. Returns q: (B, out_dim) float32."""
    B, in_dim = x.shape
    assert in_dim == packed["in_dim"]
    in_pad = packed["in_pad"]
    out_dim = packed["out_dim"]
    cdt = packed["compute_dtype"]

    # Batch tiling.  Small batches: one full tile (16-row min for bf16 sublane
    # packing).  Large batches: 128-aligned tiles, guaranteed >=2 grid steps so
    # the 'parallel' batch axis can use both TensorCores on v7x.
    if B <= 256:
        tile = _round_up(B, 16)
        b_pad = tile
    else:
        tile = min(_round_up(tile_b, 128), _round_up(pl.cdiv(B, 2), 128))
        b_pad = _round_up(B, tile)

    # Single fused pad (batch + feature dims) and cast of x.
    x_p = jnp.pad(x, ((0, b_pad - B), (0, in_pad - in_dim))).astype(cdt)

    kernel = functools.partial(_dueling_kernel, in_pad=in_pad)
    q = pl.pallas_call(
        kernel,
        out_shape=jax.ShapeDtypeStruct((b_pad, HEAD_N), jnp.float32),
        grid_spec=pltpu.PrefetchScalarGridSpec(
            num_scalar_prefetch=0,
            grid=(b_pad // tile,),
            in_specs=[
                pl.BlockSpec((tile, in_pad), lambda i: (i, 0)),         # streamed x tile
                pl.BlockSpec(packed["w_feat"].shape, lambda i: (0, 0)),  # resident
                pl.BlockSpec(packed["b_feat"].shape, lambda i: (0, 0)),  # resident
                pl.BlockSpec(packed["w_head"].shape, lambda i: (0, 0)),  # resident
                pl.BlockSpec(packed["b_head"].shape, lambda i: (0, 0)),  # resident
            ],
            out_specs=pl.BlockSpec((tile, HEAD_N), lambda i: (i, 0)),    # lane-dense
        ),
        compiler_params=pltpu.CompilerParams(
            dimension_semantics=("parallel",)),   # v7x: shard batch tiles over 2 TCs
    )(x_p, packed["w_feat"], packed["b_feat"], packed["w_head"], packed["b_head"])
    return q[:B, :out_dim]


def init_params(key, in_dim, out_dim):
    """Deterministic synthetic parameters (weights stored as (in, out))."""
    ks = jax.random.split(key, 8)

    def lin(kw, kb, fan_in, fan_out):
        bound = 1.0 / float(fan_in) ** 0.5
        w = jax.random.uniform(kw, (fan_in, fan_out), jnp.float32, -bound, bound)
        b = jax.random.uniform(kb, (1, fan_out), jnp.float32, -bound, bound)
        return w, b

    w1, b1 = lin(ks[0], ks[1], in_dim, HIDDEN)
    w2, b2 = lin(ks[2], ks[3], HIDDEN, HIDDEN)
    wv, bv = lin(ks[4], ks[5], HIDDEN, 1)
    wa, ba = lin(ks[6], ks[7], HIDDEN, out_dim)
    return (w1, b1, w2, b2, wv, bv, wa, ba)


def reference_forward(x, params):
    """Pure-JAX reference of the PyTorch forward (eval mode)."""
    w1, b1, w2, b2, wv, bv, wa, ba = params
    h = jnp.maximum(x @ w1 + b1, 0.0)
    h = jnp.maximum(h @ w2 + b2, 0.0)
    y1 = h @ wv + bv                                   # (B, 1)
    y2 = h @ wa + ba                                   # (B, out_dim)
    y2 = y2 - jnp.mean(y2, axis=1, keepdims=True)
    return y1 + y2


if __name__ == "__main__":
    # Small shapes consistent with the module (state vector in, per-action Q out).
    B, IN_DIM, OUT_DIM = 4, 26, 5

    key = jax.random.PRNGKey(0)
    kx, kp, kx2 = jax.random.split(key, 3)
    x = jax.random.normal(kx, (B, IN_DIM), jnp.float32)
    params = init_params(kp, IN_DIM, OUT_DIM)
    q_ref = reference_forward(x, params)

    # Exact f32 path (folded head is mathematically identical): tight check.
    packed_f32 = pack_params(params, IN_DIM, OUT_DIM, compute_dtype=jnp.float32)
    q_f32 = jax.block_until_ready(dueling_network_forward(x, packed_f32))
    assert q_f32.shape == (B, OUT_DIM)
    assert jnp.allclose(q_f32, q_ref, atol=1e-4, rtol=1e-4), (q_f32, q_ref)

    # Default bf16-operand path (f32 accumulation): looser check, as expected.
    packed_bf16 = pack_params(params, IN_DIM, OUT_DIM, compute_dtype=jnp.bfloat16)
    q_bf16 = jax.block_until_ready(dueling_network_forward(x, packed_bf16))
    assert q_bf16.shape == (B, OUT_DIM)
    assert jnp.allclose(q_bf16, q_ref, atol=5e-2, rtol=5e-2), (q_bf16, q_ref)

    # Multi-tile path (>=2 grid steps; exercises the 128-aligned tiling and the
    # 'parallel' batch axis used by v7x's two TensorCores).
    B2 = 300
    x2 = jax.random.normal(kx2, (B2, IN_DIM), jnp.float32)
    q2 = jax.block_until_ready(dueling_network_forward(x2, packed_f32))
    q2_ref = reference_forward(x2, params)
    assert q2.shape == (B2, OUT_DIM)
    assert jnp.allclose(q2, q2_ref, atol=1e-4, rtol=1e-4)

    print("KERNEL_OK")
</pallas_src>

<mosaic_0001>
module attributes {stable_mosaic.version = 11 : i64} {
  func.func @_dueling_kernel(%arg0: i32, %arg1: memref<16x32xf32, #tpu.memory_space<vmem>>, %arg2: memref<96x64xf32, #tpu.memory_space<vmem>>, %arg3: memref<8x64xf32, #tpu.memory_space<vmem>>, %arg4: memref<64x128xf32, #tpu.memory_space<vmem>>, %arg5: memref<8x128xf32, #tpu.memory_space<vmem>>, %arg6: memref<16x128xf32, #tpu.memory_space<vmem>>) attributes {dimension_semantics = [#tpu.dimension_semantics<parallel>], iteration_bounds = array<i64: 1>, scalar_prefetch = 0 : i64, scratch_operands = 0 : i64, tpu.core_type = #tpu.core_type<tc>, window_params = [{transform_indices = @transform_0, window_bounds = array<i64: 16, 32>}, {pipeline_mode = #tpu.pipeline_mode<synchronous>, transform_indices = @transform_1, window_bounds = array<i64: 96, 64>}, {pipeline_mode = #tpu.pipeline_mode<synchronous>, transform_indices = @transform_2, window_bounds = array<i64: 8, 64>}, {pipeline_mode = #tpu.pipeline_mode<synchronous>, transform_indices = @transform_3, window_bounds = array<i64: 64, 128>}, {pipeline_mode = #tpu.pipeline_mode<synchronous>, transform_indices = @transform_4, window_bounds = array<i64: 8, 128>}, {transform_indices = @transform_5, window_bounds = array<i64: 16, 128>}]} {
    %c0 = arith.constant 0 : index
    %c0_0 = arith.constant 0 : index
    %0 = vector.load %arg1[%c0, %c0_0] : memref<16x32xf32, #tpu.memory_space<vmem>>, vector<16x32xf32>
    %c0_1 = arith.constant 0 : index
    %c0_2 = arith.constant 0 : index
    %1 = vector.load %arg2[%c0_1, %c0_2] : memref<96x64xf32, #tpu.memory_space<vmem>>, vector<32x64xf32>
    %c32 = arith.constant 32 : index
    %c0_3 = arith.constant 0 : index
    %2 = vector.load %arg2[%c32, %c0_3] : memref<96x64xf32, #tpu.memory_space<vmem>>, vector<64x64xf32>
    %c0_4 = arith.constant 0 : index
    %c0_5 = arith.constant 0 : index
    %3 = vector.load %arg3[%c0_4, %c0_5] : memref<8x64xf32, #tpu.memory_space<vmem>>, vector<1x64xf32>
    %c1 = arith.constant 1 : index
    %c0_6 = arith.constant 0 : index
    %4 = vector.load %arg3[%c1, %c0_6] : memref<8x64xf32, #tpu.memory_space<vmem>>, vector<1x64xf32>
    %cst = arith.constant dense<0.000000e+00> : vector<16x64xf32>
    %5 = tpu.matmul %0, %1, %cst {dimension_numbers = #tpu.dot_dimension_numbers<[1], [0], [0], [1], [0, 0, 1, 1], [], []>} : vector<16x32xf32>, vector<32x64xf32>, vector<16x64xf32> -> vector<16x64xf32>
    %6 = vector.broadcast %3 : vector<1x64xf32> to vector<16x64xf32>
    %7 = arith.addf %5, %6 : vector<16x64xf32>
    %cst_7 = arith.constant 0.000000e+00 : f32
    %8 = vector.broadcast %cst_7 : f32 to vector<16x64xf32>
    %9 = arith.maximumf %7, %8 : vector<16x64xf32>
    %cst_8 = arith.constant dense<0.000000e+00> : vector<16x64xf32>
    %10 = tpu.matmul %9, %2, %cst_8 {dimension_numbers = #tpu.dot_dimension_numbers<[1], [0], [0], [1], [0, 0, 1, 1], [], []>} : vector<16x64xf32>, vector<64x64xf32>, vector<16x64xf32> -> vector<16x64xf32>
    %11 = vector.broadcast %4 : vector<1x64xf32> to vector<16x64xf32>
    %12 = arith.addf %10, %11 : vector<16x64xf32>
    %cst_9 = arith.constant 0.000000e+00 : f32
    %13 = vector.broadcast %cst_9 : f32 to vector<16x64xf32>
    %14 = arith.maximumf %12, %13 : vector<16x64xf32>
    %c0_10 = arith.constant 0 : index
    %c0_11 = arith.constant 0 : index
    %15 = vector.load %arg4[%c0_10, %c0_11] : memref<64x128xf32, #tpu.memory_space<vmem>>, vector<64x128xf32>
    %cst_12 = arith.constant dense<0.000000e+00> : vector<16x128xf32>
    %16 = tpu.matmul %14, %15, %cst_12 {dimension_numbers = #tpu.dot_dimension_numbers<[1], [0], [0], [1], [0, 0, 1, 1], [], []>} : vector<16x64xf32>, vector<64x128xf32>, vector<16x128xf32> -> vector<16x128xf32>
    %c0_13 = arith.constant 0 : index
    %c0_14 = arith.constant 0 : index
    %17 = vector.load %arg5[%c0_13, %c0_14] : memref<8x128xf32, #tpu.memory_space<vmem>>, vector<1x128xf32>
    %18 = vector.broadcast %17 : vector<1x128xf32> to vector<16x128xf32>
    %19 = arith.addf %16, %18 : vector<16x128xf32>
    %c0_15 = arith.constant 0 : index
    %c0_16 = arith.constant 0 : index
    %20 = vector.load %arg6[%c0_15, %c0_16] : memref<16x128xf32, #tpu.memory_space<vmem>>, vector<16x128xf32>
    tpu.vector_store %arg6[%c0_15, %c0_16], %19 {strides = array<i32>} : memref<16x128xf32, #tpu.memory_space<vmem>>, vector<16x128xf32>,
    return
  }
  func.func @transform_0(%arg0: i32) -> (i32, i32) {
    %c0_i32 = arith.constant 0 : i32
    %c0_i32_0 = arith.constant 0 : i32
    return %arg0, %c0_i32 : i32, i32
  }
  func.func @transform_1(%arg0: i32) -> (i32, i32) {
    %c0_i32 = arith.constant 0 : i32
    %c0_i32_0 = arith.constant 0 : i32
    %c0_i32_1 = arith.constant 0 : i32
    return %c0_i32, %c0_i32_0 : i32, i32
  }
  func.func @transform_2(%arg0: i32) -> (i32, i32) {
    %c0_i32 = arith.constant 0 : i32
    %c0_i32_0 = arith.constant 0 : i32
    %c0_i32_1 = arith.constant 0 : i32
    return %c0_i32, %c0_i32_0 : i32, i32
  }
  func.func @transform_3(%arg0: i32) -> (i32, i32) {
    %c0_i32 = arith.constant 0 : i32
    %c0_i32_0 = arith.constant 0 : i32
    %c0_i32_1 = arith.constant 0 : i32
    return %c0_i32, %c0_i32_0 : i32, i32
  }
  func.func @transform_4(%arg0: i32) -> (i32, i32) {
    %c0_i32 = arith.constant 0 : i32
    %c0_i32_0 = arith.constant 0 : i32
    %c0_i32_1 = arith.constant 0 : i32
    return %c0_i32, %c0_i32_0 : i32, i32
  }
  func.func @transform_5(%arg0: i32) -> (i32, i32) {
    %c0_i32 = arith.constant 0 : i32
    %c0_i32_0 = arith.constant 0 : i32
    return %arg0, %c0_i32 : i32, i32
  }
}

</mosaic_0001>

<bundles_post_ra>
// kernel: tpu_custom_call.1
= control target key start
LH: loop header
LB: loop body
LE: loop exit
PB: predicated region body
PF: predicated region fallthrough
CT: control target
= control target key end

     0   :  { %vm41_vm0 = vcmask 261120   ;;  %s602_s0 = inlined_call_operand.vmem [shape: f32[16,32], index: 0, kind: input, shape index: {}]   ;;  %s603_s1 = inlined_call_operand.vmem [shape: f32[96,64], index: 1, kind: input, shape index: {}]   ;;  %s604_s2 = inlined_call_operand.vmem [shape: f32[8,64], index: 2, kind: input, shape index: {}]   ;;  %s605_s3 = inlined_call_operand.vmem [shape: f32[64,128], index: 3, kind: input, shape index: {}]   ;;  %s606_s4 = inlined_call_operand.vmem [shape: f32[8,128], index: 4, kind: input, shape index: {}]   ;;  %s607_s5 = inlined_call_operand.hbm [shape: f32[16,128], index: 5, kind: output, shape index: {}]  }
   0x1   :  { %v23_v0 = vld [vmem:[%s603_s1] sm:$0xff]  ;;  %v24_v1 = vld [vmem:[%s603_s1 + $0x8] sm:$0xff]  ;;  %v25_v2 = vld [vmem:[%s603_s1 + $0x10] sm:$0xff] }
   0x2   :  { %v409_v3 = vpack.c.bf16 %v24_v1, %v23_v0  ;;  %v26_v4 = vld [vmem:[%s603_s1 + $0x18] sm:$0xff]  ;;  %v21_v5 = vld [vmem:[%s602_s0] sm:$0xff]  ;;  %v28_v8 = vld [vmem:[%s603_s1 + $0x28] sm:$0xff] }
   0x3   :  { %v413_v6 = vpack.c.bf16 %v26_v4, %v25_v2  ;;  %368 = vmatprep.mubr.msk.f32.mxu0 %vm41_vm0, %v21_v5  ;;  %v27_v7 = vld [vmem:[%s603_s1 + $0x20] sm:$0xff]  ;;  %v29_v9 = vld [vmem:[%s603_s1 + $0x30] sm:$0xff]  ;;  %v30_v11 = vld [vmem:[%s603_s1 + $0x38] sm:$0xff] }
   0x4   :  { %410 = vmatprep.subr.bf16.mxu0 %v409_v3  ;;  %v417_v10 = vpack.c.bf16 %v28_v8, %v27_v7  ;;  %v421_v12 = vpack.c.bf16 %v30_v11, %v29_v9  ;;  %v31_v13 = vld [vmem:[%s603_s1 + $0x40] sm:$0xff]  ;;  %v32_v14 = vld [vmem:[%s603_s1 + $0x48] sm:$0xff] }
   0x5   :  { %412 = vmatpush3.bf16.msra.mxu0 %v409_v3 }
   0x6   :  { %10 = vsyncpa [#allocation3], 0  ;;  %414 = vmatprep.subr.bf16.mxu0 %v413_v6  ;;  %418 = vmatprep.subr.bf16.mxu1 %v417_v10  ;;  %v425_v15 = vpack.c.bf16 %v32_v14, %v31_v13  ;;  %v22_v16 = vld [vmem:[%s602_s0 + $0x8] sm:$0xff]  ;;  %v33_v17 = vld [vmem:[%s603_s1 + $0x50] sm:$0xff]  ;;  %vm129_vm1 = vcmask 523264  }
   0x7   :  { %420 = vmatpush3.bf16.msra.mxu1 %v417_v10  ;;  %v34_v18 = vld [vmem:[%s603_s1 + $0x58] sm:$0xff]  ;;  %v213_v20 = vld [vmem:[%s605_s3] sm:$0xff]  ;;  %v214_v21 = vld [vmem:[%s605_s3 + $0x8] sm:$0xff] }
   0x8   :  { %422 = vmatprep.subr.bf16.mxu1 %v421_v12  ;;  %v429_v19 = vpack.c.bf16 %v34_v18, %v33_v17  ;;  %v215_v22 = vld [vmem:[%s605_s3 + $0x10] sm:$0xff]  ;;  %v433_v23 = vpack.c.bf16 %v214_v21, %v213_v20  ;;  %v216_v24 = vld [vmem:[%s605_s3 + $0x18] sm:$0xff]  ;;  %v217_v26 = vld [vmem:[%s605_s3 + $0x20] sm:$0xff] }
   0x9   :  { %416 = vmatpush3.bf16.msra.mxu0 %v413_v6  ;;  %v437_v25 = vpack.c.bf16 %v216_v24, %v215_v22  ;;  %v218_v27 = vld [vmem:[%s605_s3 + $0x28] sm:$0xff]  ;;  %v325_v29 = vld [vmem:[%s604_s2] ss:$0 sm:$0xff]  ;;  %v219_v36 = vld [vmem:[%s605_s3 + $0x30] sm:$0xff] }
   0xa   :  { %434 = vmatprep.subr.bf16.mxu0 %v433_v23  ;;  %v441_v28 = vpack.c.bf16 %v218_v27, %v217_v26  ;;  %v220_v37 = vld [vmem:[%s605_s3 + $0x38] sm:$0xff]  ;;  %v328_v39 = vld [vmem:[%s604_s2 + $0x1] ss:$0 sm:$0xff]  ;;  %v331_v46 = vld [vmem:[%s606_s4] ss:$0 sm:$0xff]  ;;  %s476_s3 = smov [#allocation2]  }
   0xb   :  { %424 = vmatpush3.bf16.msra.mxu1 %v421_v12  ;;  %v445_v38 = vpack.c.bf16 %v220_v37, %v219_v36  ;;  %s314_s16 = sshll.u32 %s476_s3, 4  ;;  %s315_s16 = int_to_ptr.vmem [resolvable:$true] %s314_s16 }
   0xc   :  { %369 = vmatmul.mubr.msk.f32.vlgmr.msra.gmra.mrb[0].mxu0 %vm41_vm0, %v22_v16  ;;  %426 = vmatprep.subr.bf16.mxu1 %v425_v15  ;;  %s452_s2 = scalar_lea.vmem %s315_s16, 256  ;;  %p457_p1 = scmp.lt.s32.totalorder %s315_s16, %s315_s16 }
   0xd   :  { %436 = vmatpush3.bf16.msra.mxu0 %v433_v23  ;;  %p453_p0 = scmp.ne.s32.totalorder %s315_s16, %s452_s2  ;;  %p458_p2 = scmp.lt.s32.totalorder %s452_s2, %s452_s2 }
   0xe   :  { %438 = vmatprep.subr.bf16.mxu0 %v437_v25 }
   0xf   :  { %428 = vmatpush3.bf16.msra.mxu1 %v425_v15  ;;  %p459_p3 = por %p458_p2, %p457_p1 }
  0x10   :  { %430 = vmatprep.subr.bf16.mxu1 %v429_v19 }
  0x11   :  { %440 = vmatpush3.bf16.msra.mxu0 %v437_v25  ;;  %p460_p4 = pnand %p459_p3, %p453_p0 }
  0x12   :  { %442 = vmatprep.subr.bf16.mxu0 %v441_v28 }
  0x13   :  { %432 = vmatpush3.bf16.msra.mxu1 %v429_v19 }
  0x15   :  { %444 = vmatpush3.bf16.msra.mxu0 %v441_v28 }
  0x16   :  { %446 = vmatprep.subr.bf16.mxu0 %v445_v38 }
  0x19   :  { %448 = vmatpush3.bf16.msra.mxu0 %v445_v38 }
  0xdf   :  { %v370_v30 = vpop.f32.mrb[0].mxu0 }
  0xe0   :  { %v120_v31 = vadd.f32 %v370_v30, %v325_v29  ;;  %v114_v32 = vpop.f32.mrb[1].mxu0 }
  0xe1   :  { %v115_v33 = vadd.f32 %v325_v29, %v114_v32 }
  0xe2   :  { %v124_v35 = vmax.f32 %v120_v31, 0.0 }
  0xe3   :  { %v123_v34 = vmax.f32 %v115_v33, 0.0 }
  0xe5   :  { %387 = vmatprep.mubr.msk.f32.mxu1 %vm129_vm1, %v123_v34 }
  0xe6   :  { %388 = vmatmul.mubr.msk.f32.vlgmr.msra.gmra.mrb[0].mxu1 %vm129_vm1, %v124_v35 }
 0x1b9   :  { %v389_v40 = vpop.f32.mrb[0].mxu1 }
 0x1ba   :  { %v208_v41 = vadd.f32 %v389_v40, %v328_v39  ;;  %v202_v42 = vpop.f32.mrb[1].mxu1 }
 0x1bb   :  { %v203_v43 = vadd.f32 %v328_v39, %v202_v42 }
 0x1bc   :  { %v212_v45 = vmax.f32 %v208_v41, 0.0 }
 0x1bd   :  { %v211_v44 = vmax.f32 %v203_v43, 0.0 }
 0x1bf   :  { %406 = vmatprep.mubr.msk.f32.mxu0 %vm129_vm1, %v211_v44 }
 0x1c0   :  { %407 = vmatmul.mubr.msk.f32.vlgmr.msra.gmra.mrb[2].mxu0 %vm129_vm1, %v212_v45 }
 0x293   :  { %v408_v47 = vpop.f32.mrb[2].mxu0 }
 0x294   :  { %v304_v48 = vadd.f32 %v408_v47, %v331_v46  ;;  %v298_v49 = vpop.f32.mrb[3].mxu0 }
 0x295   :  { %v299_v50 = vadd.f32 %v331_v46, %v298_v49 }
 0x296   :  { %308 = vst [vmem:[#allocation2 + $0x8] sm:$0xff] %v304_v48 }
 0x297   :  { %307 = vst [vmem:[#allocation2] sm:$0xff] %v299_v50 }
 0x298   :  { %463 = shalt.err (!%p460_p4)
}
 0x299   :  { %s464_s4 = scalar_lea.hbm %s607_s5, 256 }
 0x29a   :  { %p465_p5 = scmp.ne.s32.totalorder %s607_s5, %s464_s4  ;;  %p468_p6 = scmp.lt.u32.totalorder %s464_s4, %s607_s5 }
 0x29c   :  { %p470_p7 = pnand %p468_p6, %p465_p5 }
 0x29e   :  { %473 = shalt.err (!%p470_p7)
}
 0x29f   :  { %s477_s0 = smov 128   ;;  %s478_s23 = smov 8  }
 0x2a0   :  { %320 = dma.vmem_to_hbm [thread:$0]  %s315_s16, 256, %s607_s5, [#allocation3], %s477_s0, %s477_s0, %s478_s23  }
 0x2a1   :  { %474 = dma.done.wait [#allocation3], 256  }
 0x2a2   :  { %475 = vsyncadd [#allocation3], 4294967040 }
 0x2a3   :  { %324 = vsyncpa [#allocation3], 1 }

</bundles_post_ra>
